<compile_context>
chip_gen: v7x
topology: tpu7x:2x2x1
jax: 0.10.0
libtpu: 0.0.40
codegen_flags: <defaults>
</compile_context>

<pallas_src>
import functools

import jax
import jax.numpy as jnp
from jax.experimental import pallas as pl
from jax.experimental.pallas import tpu as pltpu


def _round_up(n, m):
    return ((n + m - 1) // m) * m


def _choose_tm(B, max_tm=512):
    """M-tile size: large enough to feed the MXU and amortize per-step pipeline
    overhead, 128-aligned for big batches (fills the 128-row v5e MXU), and
    keeping >= 2 parallel grid steps so v7x's two TensorCores both get work."""
    if B <= 256:
        return _round_up(B, 8)          # tiny batch: one sublane-aligned tile
    return max(128, min(max_tm, _round_up(pl.cdiv(B, 2), 128)))


def _quadratic_kernel(x_ref, w_ref, b_ref, o_ref, *, compute_dtype):
    # x_ref: (tm, D)   w_ref: (D, D) pre-summed over num_row and pre-transposed
    # b_ref: (1, D)    o_ref: (tm, D)
    x = x_ref[...]
    # Hot path: single MXU matmul, f32 accumulation. Operands may be bf16.
    h = jnp.dot(x.astype(compute_dtype), w_ref[...],
                preferred_element_type=jnp.float32) + b_ref[...]
    # Elementwise quadratic interaction in f32 on the VPU (no bf16 VPU on v5e).
    o_ref[...] = (x.astype(jnp.float32) * h).astype(o_ref.dtype)


def prepare_quadratic_params(weight, bias, *, num_row, input_dim,
                             compute_dtype=jnp.float32):
    """One-time parameter transform (kept OUT of the per-call path).

    weight: (num_row*D, D) PyTorch nn.Linear layout;  bias: (num_row*D,).
    Returns (w_t, b_sum) with w_t = (sum_r W_r).T of shape (D, D) in
    `compute_dtype` (set jnp.bfloat16 for 2-4x MXU throughput) and
    b_sum = sum_r b_r of shape (1, D) in f32.
    Valid only while Dropout is identity (eval mode)."""
    D, R = input_dim, num_row
    assert weight.shape == (R * D, D) and bias.shape == (R * D,)
    w_sum = weight.reshape(R, D, D).sum(axis=0)             # (D, D)
    w_t = jnp.asarray(w_sum.T, dtype=compute_dtype)         # kernel does x @ w_t
    b_sum = bias.reshape(R, D).sum(axis=0).reshape(1, D).astype(jnp.float32)
    return w_t, b_sum


def quadratic_layer(x, w_t, b_sum, *, tm=None):
    """x: (B, D).  w_t/b_sum from prepare_quadratic_params."""
    B, D = x.shape
    assert w_t.shape == (D, D) and b_sum.shape == (1, D)
    compute_dtype = w_t.dtype

    tm = tm or _choose_tm(B)
    Bp = _round_up(B, tm)
    xp = x if Bp == B else jnp.pad(x, ((0, Bp - B), (0, 0)))  # masked-tail via pad

    # VMEM budget estimate (double-buffered tiles + resident weight/bias),
    # clamped to v7x's 64 MiB physical VMEM.
    xb = jnp.dtype(x.dtype).itemsize
    wb = jnp.dtype(compute_dtype).itemsize
    est = 2 * (2 * tm * D * xb) + 2 * D * D * wb + 2 * D * 4
    vmem_limit = int(min(max(2 * est, 32 << 20), 64 << 20))

    kernel = functools.partial(_quadratic_kernel, compute_dtype=compute_dtype)

    # NOTE: for the toy D=32 demo the output last dim is < 128 (masked stores);
    # at real sizes D should be a multiple of 128 for lane-dense stores.
    out = pl.pallas_call(
        kernel,
        out_shape=jax.ShapeDtypeStruct((Bp, D), x.dtype),
        grid_spec=pltpu.PrefetchScalarGridSpec(
            num_scalar_prefetch=0,
            grid=(Bp // tm,),
            in_specs=[
                pl.BlockSpec((tm, D), lambda i: (i, 0)),   # x tile
                pl.BlockSpec((D, D), lambda i: (0, 0)),    # pre-summed weight (resident)
                pl.BlockSpec((1, D), lambda i: (0, 0)),    # pre-summed bias (resident)
            ],
            out_specs=pl.BlockSpec((tm, D), lambda i: (i, 0)),
        ),
        compiler_params=pltpu.CompilerParams(
            dimension_semantics=("parallel",),
            vmem_limit_bytes=vmem_limit),
    )(xp, w_t, b_sum)

    return out[:B] if Bp != B else out


def quadratic_layer_ref(x, weight, bias, *, num_row):
    """Pure-JAX reference mirroring the PyTorch forward (dropout = identity)."""
    B, D = x.shape
    h = (x @ weight.T + bias).reshape(B, num_row, D)
    return x * h.sum(axis=1)


if __name__ == "__main__":
    B, D, R = 16, 32, 2

    key = jax.random.PRNGKey(0)
    kx, kw, kb = jax.random.split(key, 3)

    x = jax.random.normal(kx, (B, D), dtype=jnp.float32)
    # Deterministic init mimicking nn.Linear default: U(-1/sqrt(D), 1/sqrt(D)).
    bound = 1.0 / (D ** 0.5)
    weight = jax.random.uniform(kw, (R * D, D), minval=-bound, maxval=bound,
                                dtype=jnp.float32)
    bias = jax.random.uniform(kb, (R * D,), minval=-bound, maxval=bound,
                              dtype=jnp.float32)

    # One-time parameter transform (outside the per-call / jitted hot path).
    w_t, b_sum = prepare_quadratic_params(weight, bias, num_row=R, input_dim=D)

    out = jax.block_until_ready(quadratic_layer(x, w_t, b_sum))
    ref = quadratic_layer_ref(x, weight, bias, num_row=R)
    assert out.shape == (B, D)
    assert jnp.allclose(out, ref, atol=1e-5, rtol=1e-5), "mismatch vs reference"

    # Also exercise the padded-batch path (B not a multiple of the M tile).
    x2 = jax.random.normal(kb, (13, D), dtype=jnp.float32)
    out2 = jax.block_until_ready(quadratic_layer(x2, w_t, b_sum))
    ref2 = quadratic_layer_ref(x2, weight, bias, num_row=R)
    assert jnp.allclose(out2, ref2, atol=1e-5, rtol=1e-5), "mismatch (padded tail)"

    print("KERNEL_OK")
</pallas_src>

<mosaic_0001>
module attributes {stable_mosaic.version = 11 : i64} {
  func.func @_quadratic_kernel(%arg0: i32, %arg1: memref<16x32xf32, #tpu.memory_space<vmem>>, %arg2: memref<32x32xf32, #tpu.memory_space<vmem>>, %arg3: memref<1x32xf32, #tpu.memory_space<vmem>>, %arg4: memref<16x32xf32, #tpu.memory_space<vmem>>) attributes {dimension_semantics = [#tpu.dimension_semantics<parallel>], iteration_bounds = array<i64: 1>, scalar_prefetch = 0 : i64, scratch_operands = 0 : i64, tpu.core_type = #tpu.core_type<tc>, window_params = [{transform_indices = @transform_0, window_bounds = array<i64: 16, 32>}, {pipeline_mode = #tpu.pipeline_mode<synchronous>, transform_indices = @transform_1, window_bounds = array<i64: 32, 32>}, {pipeline_mode = #tpu.pipeline_mode<synchronous>, transform_indices = @transform_2, window_bounds = array<i64: 1, 32>}, {transform_indices = @transform_3, window_bounds = array<i64: 16, 32>}]} {
    %c0 = arith.constant 0 : index
    %c0_0 = arith.constant 0 : index
    %0 = vector.load %arg1[%c0, %c0_0] : memref<16x32xf32, #tpu.memory_space<vmem>>, vector<16x32xf32>
    %c0_1 = arith.constant 0 : index
    %c0_2 = arith.constant 0 : index
    %1 = vector.load %arg2[%c0_1, %c0_2] : memref<32x32xf32, #tpu.memory_space<vmem>>, vector<32x32xf32>
    %cst = arith.constant dense<0.000000e+00> : vector<16x32xf32>
    %2 = tpu.matmul %0, %1, %cst {dimension_numbers = #tpu.dot_dimension_numbers<[1], [0], [0], [1], [0, 0, 1, 1], [], []>} : vector<16x32xf32>, vector<32x32xf32>, vector<16x32xf32> -> vector<16x32xf32>
    %c0_3 = arith.constant 0 : index
    %c0_4 = arith.constant 0 : index
    %3 = vector.load %arg3[%c0_3, %c0_4] : memref<1x32xf32, #tpu.memory_space<vmem>>, vector<1x32xf32>
    %4 = vector.broadcast %3 : vector<1x32xf32> to vector<16x32xf32>
    %5 = arith.addf %2, %4 : vector<16x32xf32>
    %6 = arith.mulf %0, %5 : vector<16x32xf32>
    %c0_5 = arith.constant 0 : index
    %c0_6 = arith.constant 0 : index
    %7 = vector.load %arg4[%c0_5, %c0_6] : memref<16x32xf32, #tpu.memory_space<vmem>>, vector<16x32xf32>
    tpu.vector_store %arg4[%c0_5, %c0_6], %6 {strides = array<i32>} : memref<16x32xf32, #tpu.memory_space<vmem>>, vector<16x32xf32>,
    return
  }
  func.func @transform_0(%arg0: i32) -> (i32, i32) {
    %c0_i32 = arith.constant 0 : i32
    %c0_i32_0 = arith.constant 0 : i32
    return %arg0, %c0_i32 : i32, i32
  }
  func.func @transform_1(%arg0: i32) -> (i32, i32) {
    %c0_i32 = arith.constant 0 : i32
    %c0_i32_0 = arith.constant 0 : i32
    %c0_i32_1 = arith.constant 0 : i32
    return %c0_i32, %c0_i32_0 : i32, i32
  }
  func.func @transform_2(%arg0: i32) -> (i32, i32) {
    %c0_i32 = arith.constant 0 : i32
    %c0_i32_0 = arith.constant 0 : i32
    %c0_i32_1 = arith.constant 0 : i32
    return %c0_i32, %c0_i32_0 : i32, i32
  }
  func.func @transform_3(%arg0: i32) -> (i32, i32) {
    %c0_i32 = arith.constant 0 : i32
    %c0_i32_0 = arith.constant 0 : i32
    return %arg0, %c0_i32 : i32, i32
  }
}

</mosaic_0001>

<bundles_post_ra>
// kernel: tpu_custom_call.1
= control target key start
LH: loop header
LB: loop body
LE: loop exit
PB: predicated region body
PF: predicated region fallthrough
CT: control target
= control target key end

     0   :  { %8 = vsyncpa [#allocation3], 0  ;;  %s342_s0 = inlined_call_operand.hbm [shape: f32[16,32], index: 0, kind: input, shape index: {}]   ;;  %s343_s1 = inlined_call_operand.hbm [shape: f32[32,32], index: 1, kind: input, shape index: {}]   ;;  %s344_s2 = inlined_call_operand.vmem [shape: f32[1,32], index: 2, kind: input, shape index: {}]   ;;  %s345_s3 = inlined_call_operand.hbm [shape: f32[16,32], index: 3, kind: output, shape index: {}]  }
   0x1   :  { %9 = vsyncpa [#allocation6], 0 }
   0x2   :  { %10 = vsyncpa [#allocation4], 0  ;;  %s265_s12 = smov [#allocation2]   ;;  %s193_s16 = scalar_lea.hbm %s342_s0, 256 }
   0x3   :  { %s16_s13 = sshll.u32 %s265_s12, 4  ;;  %p194_p0 = scmp.ne.s32.totalorder %s342_s0, %s193_s16  ;;  %s17_s13 = int_to_ptr.vmem [resolvable:$true] %s16_s13 }
   0x4   :  { %p197_p1 = scmp.lt.u32.totalorder %s193_s16, %s342_s0 }
   0x6   :  { %p199_p2 = pnand %p197_p1, %p194_p0 }
   0x8   :  { %202 = shalt.err (!%p199_p2)
}
   0x9   :  { %s203_s21 = scalar_lea.vmem %s17_s13, 256  ;;  %p208_p4 = scmp.lt.s32.totalorder %s17_s13, %s17_s13 }
   0xa   :  { %p204_p3 = scmp.ne.s32.totalorder %s17_s13, %s203_s21  ;;  %p209_p5 = scmp.lt.s32.totalorder %s203_s21, %s203_s21 }
   0xc   :  { %p210_p6 = por %p209_p5, %p208_p4 }
   0xe   :  { %p211_p7 = pnand %p210_p6, %p204_p3 }
  0x10   :  { %214 = shalt.err (!%p211_p7)
}
  0x11   :  { %s266_s22 = smov 128   ;;  %s267_s23 = smov 8  }
  0x12   :  { %22 = dma.hbm_to_vmem [thread:$0]  %s342_s0, 256, %s17_s13, [#allocation3], %s266_s22, %s266_s22, %s267_s23  }
  0x13   :  { %s268_s26 = smov [#allocation5]   ;;  %s215_s30 = scalar_lea.hbm %s343_s1, 512 }
  0x14   :  { %s28_s27 = sshll.u32 %s268_s26, 4  ;;  %p216_p8 = scmp.ne.s32.totalorder %s343_s1, %s215_s30  ;;  %s29_s27 = int_to_ptr.vmem [resolvable:$true] %s28_s27 }
  0x15   :  { %p219_p9 = scmp.lt.u32.totalorder %s215_s30, %s343_s1 }
  0x17   :  { %p221_p10 = pnand %p219_p9, %p216_p8 }
  0x19   :  { %224 = shalt.err (!%p221_p10)
}
  0x1a   :  { %s225_s8 = scalar_lea.vmem %s29_s27, 512  ;;  %p230_p12 = scmp.lt.s32.totalorder %s29_s27, %s29_s27 }
  0x1b   :  { %p226_p11 = scmp.ne.s32.totalorder %s29_s27, %s225_s8  ;;  %p231_p13 = scmp.lt.s32.totalorder %s225_s8, %s225_s8 }
  0x1d   :  { %p232_p0 = por %p231_p13, %p230_p12 }
  0x1f   :  { %p233_p1 = pnand %p232_p0, %p226_p11 }
  0x21   :  { %236 = shalt.err (!%p233_p1)
}
  0x22   :  { %34 = dma.hbm_to_vmem [thread:$0]  %s343_s1, 512, %s29_s27, [#allocation6], %s266_s22, %s266_s22, %s267_s23  }
  0x23   :  { %259 = dma.done.wait [#allocation3], 256  }
  0x24   :  { %260 = vsyncadd [#allocation3], 4294967040 }
  0x25   :  { %261 = dma.done.wait [#allocation6], 512  }
  0x26   :  { %262 = vsyncadd [#allocation6], 4294966784  ;;  %vm56_vm0 = vcmask 261120   ;;  %v45_v0 = vld [vmem:[#allocation5] sm:$0xff]  ;;  %v46_v1 = vld [vmem:[#allocation5 + $0x8] sm:$0xff]  ;;  %s269_s11 = smov [#allocation7]  }
  0x27   :  { %v47_v2 = vld [vmem:[#allocation5 + $0x10] sm:$0xff]  ;;  %v180_v3 = vpack.c.bf16 %v46_v1, %v45_v0  ;;  %v48_v4 = vld [vmem:[#allocation5 + $0x18] sm:$0xff]  ;;  %s147_s12 = sshll.u32 %s269_s11, 4  ;;  %s148_s12 = int_to_ptr.vmem [resolvable:$true] %s147_s12 }
  0x28   :  { %v43_v5 = vld [vmem:[#allocation2] sm:$0xff]  ;;  %v184_v6 = vpack.c.bf16 %v48_v4, %v47_v2  ;;  %v44_v7 = vld [vmem:[#allocation2 + $0x8] sm:$0xff]  ;;  %s237_s13 = scalar_lea.vmem %s148_s12, 256  ;;  %p242_p3 = scmp.lt.s32.totalorder %s148_s12, %s148_s12 }
  0x29   :  { %177 = vmatprep.mubr.msk.f32.mxu0 %vm56_vm0, %v43_v5  ;;  %181 = vmatprep.subr.bf16.mxu0 %v180_v3  ;;  %v160_v8 = vld [vmem:[%s344_s2] ss:$0 sm:$0xff]  ;;  %p238_p2 = scmp.ne.s32.totalorder %s148_s12, %s237_s13  ;;  %p243_p4 = scmp.lt.s32.totalorder %s237_s13, %s237_s13 }
  0x2a   :  { %183 = vmatpush3.bf16.msra.mxu0 %v180_v3 }
  0x2b   :  { %185 = vmatprep.subr.bf16.mxu0 %v184_v6  ;;  %p244_p5 = por %p243_p4, %p242_p3 }
  0x2d   :  { %p245_p6 = pnand %p244_p5, %p238_p2 }
  0x2e   :  { %187 = vmatpush3.bf16.msra.mxu0 %v184_v6 }
  0x31   :  { %178 = vmatmul.mubr.msk.f32.vlgmr.msra.gmra.mrb[0].mxu0 %vm56_vm0, %v44_v7 }
 0x104   :  { %v179_v9 = vpop.f32.mrb[0].mxu0 }
 0x105   :  { %v135_v10 = vadd.f32 %v179_v9, %v160_v8  ;;  %v129_v11 = vpop.f32.mrb[1].mxu0 }
 0x106   :  { %v130_v12 = vadd.f32 %v160_v8, %v129_v11 }
 0x107   :  { %v139_v13 = vmul.f32 %v135_v10, %v44_v7 }
 0x108   :  { %v138_v14 = vmul.f32 %v130_v12, %v43_v5 }
 0x109   :  { %141 = vst.msk [vmem:[#allocation7 + $0x8] sm:$0xff] %vm56_vm0, %v139_v13 }
 0x10a   :  { %140 = vst.msk [vmem:[#allocation7] sm:$0xff] %vm56_vm0, %v138_v14 }
 0x10b   :  { %248 = shalt.err (!%p245_p6)
}
 0x10c   :  { %s249_s15 = scalar_lea.hbm %s345_s3, 256 }
 0x10d   :  { %p250_p7 = scmp.ne.s32.totalorder %s345_s3, %s249_s15  ;;  %p253_p8 = scmp.lt.u32.totalorder %s249_s15, %s345_s3 }
 0x10f   :  { %p255_p9 = pnand %p253_p8, %p250_p7 }
 0x111   :  { %258 = shalt.err (!%p255_p9)
}
 0x112   :  { %153 = dma.vmem_to_hbm [thread:$0]  %s148_s12, 256, %s345_s3, [#allocation4], %s266_s22, %s266_s22, %s267_s23  }
 0x113   :  { %263 = dma.done.wait [#allocation4], 256  }
 0x114   :  { %264 = vsyncadd [#allocation4], 4294967040 }
 0x115   :  { %157 = vsyncpa [#allocation3], 1 }
 0x116   :  { %158 = vsyncpa [#allocation6], 1 }
 0x117   :  { %159 = vsyncpa [#allocation4], 1 }

</bundles_post_ra>
